<compile_context>
chip_gen: v5e
topology: v5e:2x2
jax: 0.10.0
libtpu: 0.0.40
codegen_flags: <defaults>
</compile_context>

<pallas_src>
import functools

import jax
import jax.numpy as jnp
from jax.experimental import pallas as pl
from jax.experimental.pallas import tpu as pltpu

LANES = 128
MAX_TILE_ROWS = 2048   # (2048,128) f32 block = 1 MiB; ~4 MiB VMEM total with double-buffering + acc
PARTS = 2              # leading "parallel" grid axis -> both TensorCores on v7x, harmless on v5e/v6e


def _bce_sum_kernel(x_ref, t_ref, out_ref, acc_ref, *,
                    n_valid, tile_rows, steps, needs_mask):
    """Per-part accumulation of  max(x,0) - x*t + log1p(exp(-|x|)).

    Inner loop is pure VPU/EUP (elementwise accumulate into a tile-shaped VMEM
    accumulator); the single cross-lane/sublane reduce happens once per part.
    """
    c = pl.program_id(0)   # part index  ("parallel")
    s = pl.program_id(1)   # step index  ("arbitrary" / accumulating)

    @pl.when(s == 0)
    def _():
        acc_ref[...] = jnp.zeros_like(acc_ref)

    x = x_ref[...]                       # float32 logits
    t = t_ref[...].astype(jnp.float32)   # bf16 {0,1} targets -> f32 (lossless)

    # Numerically-stable BCE-with-logits (matches torch's formulation):
    #   loss = max(x, 0) - x * t + log(1 + exp(-|x|))
    loss = jnp.maximum(x, 0.0) - x * t + jnp.log1p(jnp.exp(-jnp.abs(x)))

    if needs_mask:
        # Only emitted when the flat size is not a multiple of the block:
        # zero out the zero-padded tail (which would contribute log(2) each).
        row = jax.lax.broadcasted_iota(jnp.int32, (tile_rows, LANES), 0)
        lane = jax.lax.broadcasted_iota(jnp.int32, (tile_rows, LANES), 1)
        tile_idx = c * steps + s
        idx = tile_idx * (tile_rows * LANES) + row * LANES + lane
        loss = jnp.where(idx < n_valid, loss, 0.0)

    acc_ref[...] += loss

    @pl.when(s == steps - 1)
    def _():
        out_ref[...] = jnp.sum(acc_ref[...], keepdims=True).reshape(1, 1, 1)


def binary_cel(outputs, targets):
    """Pallas equivalent of F.binary_cross_entropy_with_logits(outputs, targets.float())
    with default 'mean' reduction. Returns a float32 scalar."""
    n = int(outputs.size)  # static

    x = outputs.reshape(-1).astype(jnp.float32)
    # Targets are exactly {0,1}: bf16 is lossless and halves that HBM stream.
    t = targets.reshape(-1).astype(jnp.bfloat16)

    # Choose the largest block that fits (up to MAX_TILE_ROWS) while still
    # shrinking gracefully for tiny inputs; pad by at most one block.
    rows_needed = -(-n // LANES)
    tile_rows = min(MAX_TILE_ROWS, ((-(-rows_needed // PARTS) + 7) // 8) * 8)
    steps = -(-rows_needed // (PARTS * tile_rows))
    rows_pad = PARTS * steps * tile_rows
    pad = rows_pad * LANES - n

    if pad:
        x = jnp.pad(x, (0, pad))
        t = jnp.pad(t, (0, pad))
    x2 = x.reshape(rows_pad, LANES)
    t2 = t.reshape(rows_pad, LANES)

    tile_spec = pl.BlockSpec((tile_rows, LANES), lambda c, s: (c * steps + s, 0))

    kernel = functools.partial(
        _bce_sum_kernel,
        n_valid=n,
        tile_rows=tile_rows,
        steps=steps,
        needs_mask=pad > 0,
    )

    partials = pl.pallas_call(
        kernel,
        out_shape=jax.ShapeDtypeStruct((PARTS, 1, 1), jnp.float32),
        grid_spec=pltpu.PrefetchScalarGridSpec(
            num_scalar_prefetch=0,
            grid=(PARTS, steps),
            in_specs=[tile_spec, tile_spec],
            out_specs=pl.BlockSpec((1, 1, 1), lambda c, s: (c, 0, 0)),
            scratch_shapes=[pltpu.VMEM((tile_rows, LANES), jnp.float32)],
        ),
        compiler_params=pltpu.CompilerParams(
            dimension_semantics=("parallel", "arbitrary"),
        ),
    )(x2, t2)

    return (jnp.sum(partials) / jnp.float32(n)).astype(jnp.float32)


def _reference(outputs, targets):
    x = outputs.astype(jnp.float32)
    t = targets.astype(jnp.float32)
    loss = jnp.maximum(x, 0.0) - x * t + jnp.log1p(jnp.exp(-jnp.abs(x)))
    return jnp.mean(loss)


if __name__ == "__main__":
    key = jax.random.PRNGKey(0)
    k1, k2 = jax.random.split(key)
    # small shapes consistent with a segmentation-style use of BinaryCEL
    logits = jax.random.normal(k1, (2, 4, 16, 16), dtype=jnp.float32) * 2.0
    targets = (jax.random.uniform(k2, (2, 4, 16, 16)) > 0.5).astype(jnp.int32)

    out = binary_cel(logits, targets)
    jax.block_until_ready(out)

    ref = _reference(logits, targets)
    assert jnp.allclose(out, ref, rtol=1e-5, atol=1e-6), (out, ref)
    print("KERNEL_OK")
</pallas_src>

<mosaic_0001>
module attributes {stable_mosaic.version = 11 : i64} {
  func.func @_bce_sum_kernel(%arg0: i32, %arg1: i32, %arg2: memref<8x128xf32, #tpu.memory_space<vmem>>, %arg3: memref<8x128xbf16, #tpu.memory_space<vmem>>, %arg4: memref<1x1x1xf32, #tpu.memory_space<vmem>>, %arg5: memref<8x128xf32, #tpu.memory_space<vmem>>) attributes {dimension_semantics = [#tpu.dimension_semantics<parallel>, #tpu.dimension_semantics<arbitrary>], iteration_bounds = array<i64: 2, 1>, scalar_prefetch = 0 : i64, scratch_operands = 1 : i64, tpu.core_type = #tpu.core_type<tc>, window_params = [{transform_indices = @transform_0, window_bounds = array<i64: 8, 128>}, {transform_indices = @transform_1, window_bounds = array<i64: 8, 128>}, {transform_indices = @transform_2, window_bounds = array<i64: 1, 1, 1>}]} {
    %c0_i32 = arith.constant 0 : i32
    %0 = arith.cmpi eq, %arg1, %c0_i32 : i32
    %1 = arith.extui %0 : i1 to i32
    %c0_i32_0 = arith.constant 0 : i32
    %2 = arith.cmpi ne, %1, %c0_i32_0 : i32
    scf.if %2 {
      %cst_11 = arith.constant 0.000000e+00 : f32
      %22 = vector.broadcast %cst_11 : f32 to vector<8x128xf32>
      %c0_12 = arith.constant 0 : index
      %c0_13 = arith.constant 0 : index
      %23 = vector.load %arg5[%c0_12, %c0_13] : memref<8x128xf32, #tpu.memory_space<vmem>>, vector<8x128xf32>
      tpu.vector_store %arg5[%c0_12, %c0_13], %22 {strides = array<i32>} : memref<8x128xf32, #tpu.memory_space<vmem>>, vector<8x128xf32>,
    } else {
    }
    %c0 = arith.constant 0 : index
    %c0_1 = arith.constant 0 : index
    %3 = vector.load %arg2[%c0, %c0_1] : memref<8x128xf32, #tpu.memory_space<vmem>>, vector<8x128xf32>
    %c0_2 = arith.constant 0 : index
    %c0_3 = arith.constant 0 : index
    %4 = vector.load %arg3[%c0_2, %c0_3] : memref<8x128xbf16, #tpu.memory_space<vmem>>, vector<8x128xbf16>
    %5 = arith.extf %4 : vector<8x128xbf16> to vector<8x128xf32>
    %cst = arith.constant 0.000000e+00 : f32
    %6 = vector.broadcast %cst : f32 to vector<8x128xf32>
    %7 = arith.maximumf %3, %6 : vector<8x128xf32>
    %8 = arith.mulf %3, %5 : vector<8x128xf32>
    %9 = arith.subf %7, %8 : vector<8x128xf32>
    %10 = math.absf %3 : vector<8x128xf32>
    %cst_4 = arith.constant 0.000000e+00 : f32
    %11 = vector.broadcast %cst_4 : f32 to vector<8x128xf32>
    %12 = arith.subf %11, %10 : vector<8x128xf32>
    %13 = math.exp %12 : vector<8x128xf32>
    %14 = math.log1p %13 : vector<8x128xf32>
    %15 = arith.addf %9, %14 : vector<8x128xf32>
    %c0_5 = arith.constant 0 : index
    %c0_6 = arith.constant 0 : index
    %16 = vector.load %arg5[%c0_5, %c0_6] : memref<8x128xf32, #tpu.memory_space<vmem>>, vector<8x128xf32>
    %17 = arith.addf %16, %15 : vector<8x128xf32>
    %c0_7 = arith.constant 0 : index
    %c0_8 = arith.constant 0 : index
    %18 = vector.load %arg5[%c0_7, %c0_8] : memref<8x128xf32, #tpu.memory_space<vmem>>, vector<8x128xf32>
    tpu.vector_store %arg5[%c0_7, %c0_8], %17 {strides = array<i32>} : memref<8x128xf32, #tpu.memory_space<vmem>>, vector<8x128xf32>,
    %c0_i32_9 = arith.constant 0 : i32
    %19 = arith.cmpi eq, %arg1, %c0_i32_9 : i32
    %20 = arith.extui %19 : i1 to i32
    %c0_i32_10 = arith.constant 0 : i32
    %21 = arith.cmpi ne, %20, %c0_i32_10 : i32
    scf.if %21 {
      %c0_11 = arith.constant 0 : index
      %c0_12 = arith.constant 0 : index
      %22 = vector.load %arg5[%c0_11, %c0_12] : memref<8x128xf32, #tpu.memory_space<vmem>>, vector<8x128xf32>
      %23 = vector.shape_cast %22 : vector<8x128xf32> to vector<1x8x128xf32>
      %cst_13 = arith.constant dense<0.000000e+00> : vector<1xf32>
      %24 = vector.multi_reduction <add>, %23, %cst_13 [1, 2] : vector<1x8x128xf32> to vector<1xf32>
      %25 = vector.shape_cast %24 : vector<1xf32> to vector<1x1x1xf32>
      %26 = vector.extract %25[0, 0, 0] : f32 from vector<1x1x1xf32>
      %27 = vector.broadcast %26 : f32 to vector<1x1xf32>
      %28 = vector.shape_cast %27 : vector<1x1xf32> to vector<1x1x1xf32>
      %c0_14 = arith.constant 0 : index
      %c0_15 = arith.constant 0 : index
      %c0_16 = arith.constant 0 : index
      %29 = vector.load %arg4[%c0_14, %c0_15, %c0_16] : memref<1x1x1xf32, #tpu.memory_space<vmem>>, vector<1x1x1xf32>
      tpu.vector_store %arg4[%c0_14, %c0_15, %c0_16], %28 {strides = array<i32>} : memref<1x1x1xf32, #tpu.memory_space<vmem>>, vector<1x1x1xf32>,
    } else {
    }
    return
  }
  func.func @transform_0(%arg0: i32, %arg1: i32) -> (i32, i32) {
    %c1_i32 = arith.constant 1 : i32
    %0 = arith.muli %arg0, %c1_i32 : i32
    %1 = arith.addi %0, %arg1 : i32
    %c0_i32 = arith.constant 0 : i32
    %c0_i32_0 = arith.constant 0 : i32
    return %1, %c0_i32 : i32, i32
  }
  func.func @transform_1(%arg0: i32, %arg1: i32) -> (i32, i32) {
    %c1_i32 = arith.constant 1 : i32
    %0 = arith.muli %arg0, %c1_i32 : i32
    %1 = arith.addi %0, %arg1 : i32
    %c0_i32 = arith.constant 0 : i32
    %c0_i32_0 = arith.constant 0 : i32
    return %1, %c0_i32 : i32, i32
  }
  func.func @transform_2(%arg0: i32, %arg1: i32) -> (i32, i32, i32) {
    %c0_i32 = arith.constant 0 : i32
    %c0_i32_0 = arith.constant 0 : i32
    %c0_i32_1 = arith.constant 0 : i32
    return %arg0, %c0_i32, %c0_i32_0 : i32, i32, i32
  }
}

</mosaic_0001>

<bundles_post_ra>
// kernel: tpu_custom_call.1
= control target key start
LH: loop header
LB: loop body
LE: loop exit
PB: predicated region body
PF: predicated region fallthrough
CT: control target
= control target key end

     0   :  { %7 = vsyncpa [#allocation4], 0  ;;  %s668_s0 = inlined_call_operand.hbm [shape: f32[16,128], index: 0, kind: input, shape index: {}]   ;;  %s669_s1 = inlined_call_operand.hbm [shape: bf16[16,128], index: 1, kind: input, shape index: {}]   ;;  %s670_s2 = inlined_call_operand.vmem [shape: f32[2,1,1], index: 2, kind: output, shape index: {}]  }
   0x1   :  { %9 = vsyncpa [#allocation4 + $0x1], 0 }
   0x2   :  { %10 = vsyncpa [#allocation6], 0 }
   0x3   :  { %12 = vsyncpa [#allocation6 + $0x1], 0  ;;  %s564_s9 = smov 0   ;;  %s566_s10 = smov 0  }
   0x4   :  { %s568_s11 = smov 0   ;;  %s570_s12 = smov 0  }
   0x5   :  { %s572_s13 = smov 0   ;;  %s574_s14 = smov 0  }
   0x6 LB: > { %s354_s15 = sadd.s32 4294967295, %s547_s14   ;;  %s30_s16 = sadd.s32 1, %s543_s13  ;;  %s547_s14 = sphi %s574_s14, %s18_s14   ;;  %s543_s13 = sphi %s572_s13, %s678_s13   ;;  %s539_s12 = sphi %s570_s12, %s677_s12   ;;  %s535_s11 = sphi %s568_s11, %s676_s11   ;;  %s531_s10 = sphi %s566_s10, %s675_s10   ;;  %s527_s9 = sphi %s564_s9, %s674_s9  }
   0x7   : > { %p32_p0 = scmp.ge.s32.totalorder %s30_s16, 2  ;;  %s39_s17 = sadd.s32 1, %s535_s11 }
   0x8   : > { %p46_p1 = scmp.ne.s32.totalorder %s535_s11, %s531_s10  ;;  %p47_p2 = scmp.eq.s32.totalorder %s547_s14, 0 }
   0x9   : > { %s680_s16 = smov (%p32_p0, %s30_s16), 0  ;;  %p52_p4 = scmp.ne.s32.totalorder %s531_s10, %s527_s9 }
   0xa   : > { %p600_p3 = por %p47_p2, %p46_p1  ;;  %s36_s19 = ssub.s32 %s543_s13, %s680_s16 }
   0xb   : > { %p53_p5 = scmp.eq.s32.totalorder %s354_s15, 0  ;;  %p37_p6 = scmp.eq.s32.totalorder %s36_s19, 0 }
   0xc   : > { %p380_p8 = scmp.lt.s32.totalorder %s547_s14, 2  ;;  %s130_s22 = sand.u32 1, %s535_s11  }
   0xd   : > { %p607_p7 = por %p53_p5, %p52_p4  ;;  %s359_s23 = sshll.u32 %s543_s13, 3 }
   0xe   : > { %s613_s21 = scalar_select %p37_p6, %s535_s11, %s39_s17  }
   0xf   : > { %s358_s24 = sshll.u32 %s130_s22, 3  ;;  %s139_s27 = scalar_lea.hbm %s668_s0, %s359_s23 }
  0x10   : > { %s141_s28 = sshll.u32 %s139_s27, 4  ;;  %s134_s29 = scalar_lea.vmem [#allocation3], %s358_s24  ;;  %s142_s28 = int_to_ptr.hbm [resolvable:$true] %s141_s28 }
  0x11   : > { %s143_s30 = sshll.u32 %s134_s29, 4  ;;  %p622_p9 = pnand %p380_p8, %p600_p3  ;;  %s144_s30 = int_to_ptr.vmem [resolvable:$true] %s143_s30 }
  0x12   : > { %p362_p10 = scmp.ge.s32.totalorder %s547_s14, 1  ;;  %p168_p11 = scmp.lt.s32.totalorder %s547_s14, 3 }
  0x13   : > { %s360_s4 = sshll.u32 %s130_s22, 2  ;;  %s131_s5 = scalar_lea.sflag [#allocation4], %s130_s22 }
  0x14   : > { %376 = dma.hbm_to_vmem [thread:$0]  (!%p622_p9), %s142_s28, 128, %s144_s30, %s131_s5  }
  0x15   : > { %p169_p12 = pnand %p362_p10, %p168_p11  ;;  %s361_s6 = sshll.u32 %s543_s13, 2 }
  0x16   : > { %s154_s7 = scalar_lea.vmem [#allocation5], %s360_s4  ;;  %s159_s17 = scalar_lea.hbm %s669_s1, %s361_s6 }
  0x17   : > { %s163_s8 = sshll.u32 %s154_s7, 4  ;;  %s161_s18 = sshll.u32 %s159_s17, 4  ;;  %s164_s8 = int_to_ptr.vmem [resolvable:$true] %s163_s8  ;;  %s162_s18 = int_to_ptr.hbm [resolvable:$true] %s161_s18 }
  0x18   : > { %s151_s19 = scalar_lea.sflag [#allocation6], %s130_s22  ;;  %172 = sbr.rel (%p169_p12) target bundleno = 241 (0xf1), region = 28 }
  0x19   : > { %379 = dma.hbm_to_vmem [thread:$0]  (!%p622_p9), %s162_s18, 64, %s164_s8, %s151_s19  }
  0x1a   : > { %s174_s23 = sand.u32 (!%p169_p12), 1, %s531_s10  }
  0x1b   : > { %s363_s24 = sshll.u32 (!%p169_p12), %s174_s23, 3  ;;  %s175_s25 = scalar_lea.sflag (!%p169_p12), [#allocation4], %s174_s23 }
  0x1c   : > { %s178_s26 = scalar_lea.vmem (!%p169_p12), [#allocation3], %s363_s24 }
  0x1d   : > { %518 = dma.done.wait (%p607_p7), %s175_s25, 128  }
  0x1e   : > { %520 = vsyncadd (%p607_p7), %s175_s25, 4294967168  ;;  %s364_s27 = sshll.u32 %s174_s23, 2  ;;  %s185_s28 = scalar_lea.sflag [#allocation6], %s174_s23 }
  0x1f   : > { %s188_s29 = scalar_lea.vmem [#allocation5], %s364_s27 }
  0x20   : > { %522 = dma.done.wait (%p607_p7), %s185_s28, 64  }
  0x21   : > { %524 = vsyncadd (%p607_p7), %s185_s28, 4294967232  ;;  %v223_v0 = vld [vmem:[%s178_s26] sm:$0xff]  ;;  %v224_v4 = vld [vmem:[%s188_s29] sm:$0xf]  ;;  %p215_p13 = scmp.lt.s32.totalorder %s539_s12, 1  ;;  %vm260_vm1 = vcmask 0  }
  0x22   : > { %v229_v1 = vand.u32 2147483647, %v223_v0  ;;  %v225_v6 = vunpack.c.l.bf16 %v224_v4  ;;  %v226_v10 = vmax.f32 %v223_v0, 0.0 }
  0x23   : > { %s682_s12 = smov (!%p215_p13, %s539_s12), 1 }
  0x24   : > { %v230_v2 = vsub.f32 0.0, %v229_v1  ;;  %v227_v11 = vmul.f32 %v225_v6, %v223_v0  ;;  %s217_s30 = scalar_lea.vmem %s670_s2, %s682_s12 }
  0x26   : > { %v231_v3 = vmul.f32 1.442695, %v230_v2  ;;  %v228_v15 = vsub.f32 %v226_v10, %v227_v11 }
  0x28   : > { %429 = vpow2.f32 %v231_v3 }
  0x2e   : > { %v430_v5 = vpop.eup %429 }
  0x2f   : > { %v233_v7 = vadd.f32 1.0, %v430_v5  ;;  %v236_v8 = vmul.f32 -0.5, %v430_v5  ;;  %v239_v12 = vand.u32 2147483647, %v430_v5 }
  0x31   : > { %431 = vlog2.f32 %v233_v7  ;;  %v237_v9 = vadd.f32 1.0, %v236_v8  ;;  %vm240_vm0 = vcmp.lt.f32.partialorder %v239_v12, 0.0004427343 }
  0x33   : > { %v238_v13 = vmul.f32 %v430_v5, %v237_v9 }
  0x37   : > { %v432_v14 = vpop.eup %431 }
  0x38   : > { %v235_v16 = vmul.f32 0.6931472, %v432_v14 }
  0x3a   : > { %v241_v17 = vsel %vm240_vm0, %v238_v13, %v235_v16 }
  0x3b   : > { %v242_v18 = vadd.f32 %v241_v17, %v228_v15 }
  0x3d   : > { %250 = vadd.xlane.f32.xlu0 %v242_v18 }
  0xb0   : > { %v251_v19 = vpop.xlane.xlu0 %250 }
  0xb1   : > { %v252_v20 = vrot.slane %v251_v19, 4 }
  0xb3   : > { %v253_v21 = vadd.f32 %v252_v20, %v251_v19 }
  0xb5   : > { %v254_v22 = vrot.slane %v253_v21, 2 }
  0xb7   : > { %v255_v23 = vadd.f32 %v254_v22, %v253_v21 }
  0xb9   : > { %v256_v24 = vrot.slane %v255_v23, 1 }
  0xbb   : > { %v257_v25 = vadd.f32 %v256_v24, %v255_v23 }
  0xbd   : > { %367 = vpush %v257_v25 }
  0xee   : > { %s368_s3 = spop %367 }
  0xef   : > { %v259_v26 = vstv %s368_s3 }
  0xf0   : > { %261 = vst.msk [vmem:[%s217_s30] sm:$0x1] %vm260_vm1, %v259_v26 }
  0xf1 PF: > { %s18_s14 = sadd.s32 1, %s547_s14   ;;  %s674_s9 = smov %s531_s10 }
  0xf2   : > { %p15_p0 = scmp.ge.s32.totalorder %s18_s14, 4   ;;  %s675_s10 = smov %s535_s11 }
  0xf3   : > { %s676_s11 = smov %s613_s21  ;;  %s677_s12 = smov %s543_s13 }
  0xf4   : > { %s678_s13 = smov %s680_s16  ;;  %17 = sbr.rel (!%p15_p0) target bundleno = 6 (0x6), region = 89 }
  0xf9   :  { %279 = vsyncpa [#allocation4], 1 }
  0xfa   :  { %281 = vsyncpa [#allocation4 + $0x1], 1 }
  0xfb   :  { %282 = vsyncpa [#allocation6], 1 }
  0xfc   :  { %284 = vsyncpa [#allocation6 + $0x1], 1 }

</bundles_post_ra>
